<compile_context>
chip_gen: v7x
topology: tpu7x:2x2x1
jax: 0.10.0
libtpu: 0.0.40
codegen_flags: <defaults>
</compile_context>

<pallas_src>
import functools
import math

import jax
import jax.numpy as jnp
from jax import lax
from jax.experimental import pallas as pl
from jax.experimental.pallas import tpu as pltpu

_OUT_LANES = 128        # lane-dense packed output slab width
_IDX_OFF = 64           # lane offset of the (float-encoded) expert indices
_NEG_BIG = -1e30        # finite "-inf" stand-in for padded experts
_EXTRACTED = -3e38      # sentinel for already-extracted experts (< _NEG_BIG)
_MIN_STEPS = 4          # keep >= this many grid steps when tokens allow it


def _round_up(x, m):
    return ((x + m - 1) // m) * m


def _physical_vmem_bytes():
    """Per-core VMEM capacity; conservative 64 MiB (v7x) fallback."""
    default = 64 * 1024 * 1024
    try:
        info = pltpu.get_tpu_info()
        return int(getattr(info, "vmem_capacity_bytes", default))
    except Exception:
        return default


def _choose_tile_t(T, D, x_itemsize, w_itemsize, e_pad, tile_budget_bytes):
    """Largest 8-multiple token tile whose pipeline buffers fit the budget."""
    # Resident weight: constant block index, but the auto pipeline still
    # allocates two buffers -> account for both.
    w_bytes = 2 * D * e_pad * w_itemsize
    # Per-token VMEM: double-buffered x tile + double-buffered packed output
    # slab + headroom for in-kernel f32 intermediates (logits/work/slabs).
    per_tok = 2 * D * x_itemsize + 2 * _OUT_LANES * 4 + 4 * e_pad * 4
    avail = max(tile_budget_bytes - w_bytes, per_tok * 8)
    tile = (avail // per_tok) // 8 * 8
    tile = max(8, min(int(tile), 2048))
    t_pad8 = _round_up(T, 8)
    tile = min(tile, t_pad8)
    # Keep >= _MIN_STEPS grid steps when possible (v7x megacore + pipelining).
    if t_pad8 >= _MIN_STEPS * 8:
        tile = min(tile, _round_up((T + _MIN_STEPS - 1) // _MIN_STEPS, 8))
    return max(tile, 8)


def _moe_gate_kernel(x_ref, w_ref, out_ref, *, top_k, n_experts, norm_topk_prob):
    """One token tile: logits -> top-k on logits -> softmax weights -> packed slab."""
    x = x_ref[...]                                   # (TILE_T, D), native dtype
    w = w_ref[...]                                   # (D, E_pad), native dtype

    # logits = x @ W^T (weight pre-transposed in the wrapper); f32 accumulate.
    logits = lax.dot_general(
        x, w, (((1,), (0,)), ((), ())),
        preferred_element_type=jnp.float32)          # (TILE_T, E_pad)

    tile_t, e_pad = logits.shape
    expert_iota = lax.broadcasted_iota(jnp.int32, (tile_t, e_pad), 1)

    # Mask padded experts so softmax / top-k never see them.
    logits = jnp.where(expert_iota < n_experts, logits, jnp.float32(_NEG_BIG))

    # Row max: softmax stabilizer AND the k=0 top value (softmax is monotone,
    # so top-k on logits gives the same experts as top-k on scores).
    m = jnp.max(logits, axis=-1, keepdims=True)      # (TILE_T, 1)

    out_lane = lax.broadcasted_iota(jnp.int32, out_ref.shape, 1)  # (TILE_T, 128)
    slab_l = jnp.full(out_ref.shape, jnp.float32(_NEG_BIG), jnp.float32)
    slab_i = jnp.zeros(out_ref.shape, jnp.float32)   # indices as exact f32 values

    work = logits
    for k in range(top_k):
        vmax = m if k == 0 else jnp.max(work, axis=-1, keepdims=True)
        # first-index argmax (ties -> lowest expert index, as torch.topk / lax.top_k)
        arg = jnp.min(
            jnp.where(work == vmax, expert_iota, jnp.int32(e_pad)),
            axis=-1, keepdims=True)                  # (TILE_T, 1) int32
        slab_l = jnp.where(out_lane == k, vmax, slab_l)
        slab_i = jnp.where(out_lane == _IDX_OFF + k, arg.astype(jnp.float32), slab_i)
        if k + 1 < top_k:                            # no dead mask after last pick
            work = jnp.where(expert_iota == arg, jnp.float32(_EXTRACTED), work)

    # Softmax denominator over all experts (padded columns underflow to 0),
    # then exp/scale only the selected slab (unset lanes underflow to 0.0).
    denom = jnp.sum(jnp.exp(logits - m), axis=-1, keepdims=True)
    w_slab = jnp.exp(slab_l - m) * pl.reciprocal(denom, approx=True)

    if top_k > 1 and norm_topk_prob:
        topk_sum = jnp.sum(w_slab, axis=-1, keepdims=True)
        w_slab = w_slab * pl.reciprocal(topk_sum + 1e-20, approx=True)

    # Pack weights (lanes < 64) and float-encoded indices (lanes >= 64) into
    # one slab; single unmasked full-tile store.
    out_ref[...] = jnp.where(out_lane < _IDX_OFF, w_slab, slab_i)


def moe_gate_forward(hidden_states, weight, *, top_k=2, norm_topk_prob=True,
                     scoring_func="softmax"):
    """JAX/Pallas equivalent of MoEGate.forward (eval mode).

    hidden_states: (B, S, D) float
    weight:        (E, D) float  (same layout as the nn.Parameter)
    returns (topk_idx (T, top_k) int32, topk_weight (T, top_k) float32, aux_loss)
    """
    if scoring_func != "softmax":
        raise NotImplementedError(
            f"insupportable scoring function for MoE gating: {scoring_func}")

    B, S, D = hidden_states.shape
    E = weight.shape[0]
    T = B * S
    assert 1 <= top_k <= _IDX_OFF, "top_k must fit the packed slab layout"

    x = hidden_states.reshape(T, D)

    # Pad experts to exactly one lane group (no wider); transpose once so the
    # kernel's RHS contracts its leading dim (no per-step transpose).
    E_pad = _round_up(E, 128)
    w = weight if E_pad == E else jnp.pad(weight, ((0, E_pad - E), (0, 0)))
    w_t = jnp.transpose(w)                           # (D, E_pad)

    # VMEM-budget-aware token tile + explicit scoped-VMEM limit.
    phys_vmem = _physical_vmem_bytes()
    vmem_limit = int(phys_vmem * 0.90)
    tile_budget = int(phys_vmem * 0.70)
    x_sz = jnp.dtype(x.dtype).itemsize
    w_sz = jnp.dtype(w_t.dtype).itemsize
    TILE_T = _choose_tile_t(T, D, x_sz, w_sz, E_pad, tile_budget)

    T_pad = _round_up(T, TILE_T)
    if T_pad != T:
        x = jnp.pad(x, ((0, T_pad - T), (0, 0)))

    kernel = functools.partial(
        _moe_gate_kernel, top_k=top_k, n_experts=E,
        norm_topk_prob=norm_topk_prob)

    cost = pl.CostEstimate(
        flops=2 * T_pad * D * E_pad,
        transcendentals=T_pad * (E_pad + _OUT_LANES),
        bytes_accessed=T_pad * D * x_sz + D * E_pad * w_sz
        + T_pad * _OUT_LANES * 4)

    packed = pl.pallas_call(
        kernel,
        out_shape=jax.ShapeDtypeStruct((T_pad, _OUT_LANES), jnp.float32),
        grid=(T_pad // TILE_T,),
        in_specs=[
            pl.BlockSpec((TILE_T, D), lambda i: (i, 0)),    # token tiles stream
            pl.BlockSpec((D, E_pad), lambda i: (0, 0)),     # weight stays resident
        ],
        out_specs=pl.BlockSpec((TILE_T, _OUT_LANES), lambda i: (i, 0)),
        compiler_params=pltpu.CompilerParams(
            dimension_semantics=("parallel",),
            vmem_limit_bytes=vmem_limit),
        cost_estimate=cost,
    )(x, w_t)

    topk_weight = packed[:T, :top_k]
    topk_idx = packed[:T, _IDX_OFF:_IDX_OFF + top_k].astype(jnp.int32)
    aux_loss = jnp.float32(0.0)  # eval mode: self.training is False
    return topk_idx, topk_weight, aux_loss


def _reference_forward(hidden_states, weight, *, top_k=2, norm_topk_prob=True):
    """Pure-JAX reference for a sanity check."""
    B, S, D = hidden_states.shape
    x = hidden_states.reshape(-1, D)
    logits = x @ weight.T
    scores = jax.nn.softmax(logits, axis=-1)
    topk_w, topk_i = lax.top_k(scores, top_k)
    if top_k > 1 and norm_topk_prob:
        topk_w = topk_w / (jnp.sum(topk_w, axis=-1, keepdims=True) + 1e-20)
    return topk_i.astype(jnp.int32), topk_w


if __name__ == "__main__":
    # Small config consistent with the module: bsz=2, seq_len=8, dim=32,
    # n_routed_experts=8, num_experts_per_tok=2, norm_topk_prob=True.
    B, S, D = 2, 8, 32
    E, TOP_K = 8, 2

    key = jax.random.PRNGKey(0)
    k_x, k_w = jax.random.split(key)

    hidden_states = jax.random.normal(k_x, (B, S, D), dtype=jnp.float32)

    # Deterministic Kaiming-uniform init (a=sqrt(5)) for weight of shape (E, D):
    # gain = sqrt(2/(1+a^2)) = sqrt(1/3); bound = gain*sqrt(3/fan_in) = 1/sqrt(D)
    bound = 1.0 / math.sqrt(D)
    weight = jax.random.uniform(k_w, (E, D), dtype=jnp.float32,
                                minval=-bound, maxval=bound)

    topk_idx, topk_weight, aux_loss = moe_gate_forward(
        hidden_states, weight, top_k=TOP_K, norm_topk_prob=True)
    jax.block_until_ready((topk_idx, topk_weight, aux_loss))

    # Sanity check against a pure-JAX reference (tolerance accounts for the
    # EUP approximate reciprocals used for the softmax / renorm denominators;
    # indices must match exactly since softmax is monotone per row).
    ref_idx, ref_w = _reference_forward(
        hidden_states, weight, top_k=TOP_K, norm_topk_prob=True)
    assert topk_idx.shape == (B * S, TOP_K)
    assert topk_weight.shape == (B * S, TOP_K)
    assert jnp.all(topk_idx == ref_idx), "top-k indices mismatch"
    assert jnp.allclose(topk_weight, ref_w, atol=2e-3, rtol=2e-3), \
        "top-k weights mismatch"

    print("KERNEL_OK")
</pallas_src>

<mosaic_0001>
module attributes {stable_mosaic.version = 11 : i64} {
  func.func @_moe_gate_kernel(%arg0: i32, %arg1: memref<16x32xf32, #tpu.memory_space<vmem>>, %arg2: memref<32x128xf32, #tpu.memory_space<vmem>>, %arg3: memref<16x128xf32, #tpu.memory_space<vmem>>) attributes {dimension_semantics = [#tpu.dimension_semantics<parallel>], iteration_bounds = array<i64: 1>, scalar_prefetch = 0 : i64, scratch_operands = 0 : i64, tpu.core_type = #tpu.core_type<tc>, window_params = [{transform_indices = @transform_0, window_bounds = array<i64: 16, 32>}, {pipeline_mode = #tpu.pipeline_mode<synchronous>, transform_indices = @transform_1, window_bounds = array<i64: 32, 128>}, {transform_indices = @transform_2, window_bounds = array<i64: 16, 128>}]} {
    %c0 = arith.constant 0 : index
    %c0_0 = arith.constant 0 : index
    %0 = vector.load %arg1[%c0, %c0_0] : memref<16x32xf32, #tpu.memory_space<vmem>>, vector<16x32xf32>
    %c0_1 = arith.constant 0 : index
    %c0_2 = arith.constant 0 : index
    %1 = vector.load %arg2[%c0_1, %c0_2] : memref<32x128xf32, #tpu.memory_space<vmem>>, vector<32x128xf32>
    %cst = arith.constant dense<0.000000e+00> : vector<16x128xf32>
    %2 = tpu.matmul %0, %1, %cst {dimension_numbers = #tpu.dot_dimension_numbers<[1], [0], [0], [1], [0, 0, 1, 1], [], []>} : vector<16x32xf32>, vector<32x128xf32>, vector<16x128xf32> -> vector<16x128xf32>
    %3 = tpu.iota {dimensions = array<i32: 1>} : vector<16x128xi32>
    %c8_i32 = arith.constant 8 : i32
    %4 = vector.broadcast %c8_i32 : i32 to vector<16x128xi32>
    %5 = arith.cmpi slt, %3, %4 : vector<16x128xi32>
    %cst_3 = arith.constant -1.000000e+30 : f32
    %6 = vector.broadcast %cst_3 : f32 to vector<16x128xf32>
    %7 = arith.select %5, %2, %6 : vector<16x128xi1>, vector<16x128xf32>
    %cst_4 = arith.constant dense<0xFF800000> : vector<16xf32>
    %8 = vector.multi_reduction <maximumf>, %7, %cst_4 [1] : vector<16x128xf32> to vector<16xf32>
    %9 = vector.shape_cast %8 : vector<16xf32> to vector<16x1xf32>
    %10 = tpu.iota {dimensions = array<i32: 1>} : vector<16x128xi32>
    %cst_5 = arith.constant -1.000000e+30 : f32
    %11 = vector.broadcast %cst_5 : f32 to vector<16x128xf32>
    %cst_6 = arith.constant 0.000000e+00 : f32
    %12 = vector.broadcast %cst_6 : f32 to vector<16x128xf32>
    %13 = vector.broadcast %9 : vector<16x1xf32> to vector<16x128xf32>
    %14 = arith.cmpf oeq, %7, %13 : vector<16x128xf32>
    %c128_i32 = arith.constant 128 : i32
    %15 = vector.broadcast %c128_i32 : i32 to vector<16x128xi32>
    %16 = arith.select %14, %3, %15 : vector<16x128xi1>, vector<16x128xi32>
    %cst_7 = arith.constant dense<2147483647> : vector<16xi32>
    %17 = vector.multi_reduction <minsi>, %16, %cst_7 [1] : vector<16x128xi32> to vector<16xi32>
    %18 = vector.shape_cast %17 : vector<16xi32> to vector<16x1xi32>
    %c0_i32 = arith.constant 0 : i32
    %19 = vector.broadcast %c0_i32 : i32 to vector<16x128xi32>
    %20 = arith.cmpi eq, %10, %19 : vector<16x128xi32>
    %21 = vector.shape_cast %9 : vector<16x1xf32> to vector<16x1xf32>
    %22 = vector.broadcast %21 : vector<16x1xf32> to vector<16x128xf32>
    %23 = arith.select %20, %22, %11 : vector<16x128xi1>, vector<16x128xf32>
    %c64_i32 = arith.constant 64 : i32
    %24 = vector.broadcast %c64_i32 : i32 to vector<16x128xi32>
    %25 = arith.cmpi eq, %10, %24 : vector<16x128xi32>
    %26 = arith.sitofp %18 : vector<16x1xi32> to vector<16x1xf32>
    %27 = vector.shape_cast %26 : vector<16x1xf32> to vector<16x1xf32>
    %28 = vector.broadcast %27 : vector<16x1xf32> to vector<16x128xf32>
    %29 = arith.select %25, %28, %12 : vector<16x128xi1>, vector<16x128xf32>
    %30 = vector.broadcast %18 : vector<16x1xi32> to vector<16x128xi32>
    %31 = arith.cmpi eq, %3, %30 : vector<16x128xi32>
    %cst_8 = arith.constant -3.000000e+38 : f32
    %32 = vector.broadcast %cst_8 : f32 to vector<16x128xf32>
    %33 = arith.select %31, %32, %7 : vector<16x128xi1>, vector<16x128xf32>
    %cst_9 = arith.constant dense<0xFF800000> : vector<16xf32>
    %34 = vector.multi_reduction <maximumf>, %33, %cst_9 [1] : vector<16x128xf32> to vector<16xf32>
    %35 = vector.shape_cast %34 : vector<16xf32> to vector<16x1xf32>
    %36 = vector.broadcast %35 : vector<16x1xf32> to vector<16x128xf32>
    %37 = arith.cmpf oeq, %33, %36 : vector<16x128xf32>
    %c128_i32_10 = arith.constant 128 : i32
    %38 = vector.broadcast %c128_i32_10 : i32 to vector<16x128xi32>
    %39 = arith.select %37, %3, %38 : vector<16x128xi1>, vector<16x128xi32>
    %cst_11 = arith.constant dense<2147483647> : vector<16xi32>
    %40 = vector.multi_reduction <minsi>, %39, %cst_11 [1] : vector<16x128xi32> to vector<16xi32>
    %41 = vector.shape_cast %40 : vector<16xi32> to vector<16x1xi32>
    %c1_i32 = arith.constant 1 : i32
    %42 = vector.broadcast %c1_i32 : i32 to vector<16x128xi32>
    %43 = arith.cmpi eq, %10, %42 : vector<16x128xi32>
    %44 = vector.shape_cast %35 : vector<16x1xf32> to vector<16x1xf32>
    %45 = vector.broadcast %44 : vector<16x1xf32> to vector<16x128xf32>
    %46 = arith.select %43, %45, %23 : vector<16x128xi1>, vector<16x128xf32>
    %c65_i32 = arith.constant 65 : i32
    %47 = vector.broadcast %c65_i32 : i32 to vector<16x128xi32>
    %48 = arith.cmpi eq, %10, %47 : vector<16x128xi32>
    %49 = arith.sitofp %41 : vector<16x1xi32> to vector<16x1xf32>
    %50 = vector.shape_cast %49 : vector<16x1xf32> to vector<16x1xf32>
    %51 = vector.broadcast %50 : vector<16x1xf32> to vector<16x128xf32>
    %52 = arith.select %48, %51, %29 : vector<16x128xi1>, vector<16x128xf32>
    %53 = vector.broadcast %9 : vector<16x1xf32> to vector<16x128xf32>
    %54 = arith.subf %7, %53 : vector<16x128xf32>
    %55 = math.exp %54 : vector<16x128xf32>
    %cst_12 = arith.constant dense<0.000000e+00> : vector<16xf32>
    %56 = vector.multi_reduction <add>, %55, %cst_12 [1] : vector<16x128xf32> to vector<16xf32>
    %57 = vector.shape_cast %56 : vector<16xf32> to vector<16x1xf32>
    %58 = vector.broadcast %9 : vector<16x1xf32> to vector<16x128xf32>
    %59 = arith.subf %46, %58 : vector<16x128xf32>
    %60 = math.exp %59 : vector<16x128xf32>
    %61 = tpu.reciprocal %57 {approx = true} : vector<16x1xf32> -> vector<16x1xf32>
    %62 = vector.broadcast %61 : vector<16x1xf32> to vector<16x128xf32>
    %63 = arith.mulf %60, %62 : vector<16x128xf32>
    %cst_13 = arith.constant dense<0.000000e+00> : vector<16xf32>
    %64 = vector.multi_reduction <add>, %63, %cst_13 [1] : vector<16x128xf32> to vector<16xf32>
    %65 = vector.shape_cast %64 : vector<16xf32> to vector<16x1xf32>
    %cst_14 = arith.constant 9.99999968E-21 : f32
    %66 = vector.broadcast %cst_14 : f32 to vector<16x1xf32>
    %67 = arith.addf %65, %66 : vector<16x1xf32>
    %68 = tpu.reciprocal %67 {approx = true} : vector<16x1xf32> -> vector<16x1xf32>
    %69 = vector.broadcast %68 : vector<16x1xf32> to vector<16x128xf32>
    %70 = arith.mulf %63, %69 : vector<16x128xf32>
    %c64_i32_15 = arith.constant 64 : i32
    %71 = vector.broadcast %c64_i32_15 : i32 to vector<16x128xi32>
    %72 = arith.cmpi slt, %10, %71 : vector<16x128xi32>
    %73 = arith.select %72, %70, %52 : vector<16x128xi1>, vector<16x128xf32>
    %c0_16 = arith.constant 0 : index
    %c0_17 = arith.constant 0 : index
    %74 = vector.load %arg3[%c0_16, %c0_17] : memref<16x128xf32, #tpu.memory_space<vmem>>, vector<16x128xf32>
    tpu.vector_store %arg3[%c0_16, %c0_17], %73 {strides = array<i32>} : memref<16x128xf32, #tpu.memory_space<vmem>>, vector<16x128xf32>,
    return
  }
  func.func @transform_0(%arg0: i32) -> (i32, i32) {
    %c0_i32 = arith.constant 0 : i32
    %c0_i32_0 = arith.constant 0 : i32
    return %arg0, %c0_i32 : i32, i32
  }
  func.func @transform_1(%arg0: i32) -> (i32, i32) {
    %c0_i32 = arith.constant 0 : i32
    %c0_i32_0 = arith.constant 0 : i32
    %c0_i32_1 = arith.constant 0 : i32
    return %c0_i32, %c0_i32_0 : i32, i32
  }
  func.func @transform_2(%arg0: i32) -> (i32, i32) {
    %c0_i32 = arith.constant 0 : i32
    %c0_i32_0 = arith.constant 0 : i32
    return %arg0, %c0_i32 : i32, i32
  }
}

</mosaic_0001>

<bundles_post_ra>
// kernel: tpu_custom_call.1
= control target key start
LH: loop header
LB: loop body
LE: loop exit
PB: predicated region body
PF: predicated region fallthrough
CT: control target
= control target key end

     0   :  { %7 = vsyncpa [#allocation3], 0  ;;  %s503_s0 = inlined_call_operand.hbm [shape: f32[16,32], index: 0, kind: input, shape index: {}]   ;;  %s504_s1 = inlined_call_operand.hbm [shape: f32[32,128], index: 1, kind: input, shape index: {}]   ;;  %s505_s2 = inlined_call_operand.hbm [shape: f32[16,128], index: 2, kind: output, shape index: {}]  }
   0x1   :  { %8 = vsyncpa [#allocation6], 0 }
   0x2   :  { %9 = vsyncpa [#allocation4], 0  ;;  %s398_s9 = smov [#allocation2]   ;;  %s326_s13 = scalar_lea.hbm %s503_s0, 256 }
   0x3   :  { %s15_s10 = sshll.u32 %s398_s9, 4  ;;  %p327_p0 = scmp.ne.s32.totalorder %s503_s0, %s326_s13  ;;  %s16_s10 = int_to_ptr.vmem [resolvable:$true] %s15_s10 }
   0x4   :  { %p330_p1 = scmp.lt.u32.totalorder %s326_s13, %s503_s0 }
   0x6   :  { %p332_p2 = pnand %p330_p1, %p327_p0 }
   0x8   :  { %335 = shalt.err (!%p332_p2)
}
   0x9   :  { %s336_s18 = scalar_lea.vmem %s16_s10, 256  ;;  %p341_p4 = scmp.lt.s32.totalorder %s16_s10, %s16_s10 }
   0xa   :  { %p337_p3 = scmp.ne.s32.totalorder %s16_s10, %s336_s18  ;;  %p342_p5 = scmp.lt.s32.totalorder %s336_s18, %s336_s18 }
   0xc   :  { %p343_p6 = por %p342_p5, %p341_p4 }
   0xe   :  { %p344_p7 = pnand %p343_p6, %p337_p3 }
  0x10   :  { %347 = shalt.err (!%p344_p7)
}
  0x11   :  { %s399_s19 = smov 128   ;;  %s400_s20 = smov 8  }
  0x12   :  { %21 = dma.hbm_to_vmem [thread:$0]  %s503_s0, 256, %s16_s10, [#allocation3], %s399_s19, %s399_s19, %s400_s20  }
  0x13   :  { %s401_s23 = smov [#allocation5]   ;;  %s348_s27 = scalar_lea.hbm %s504_s1, 512 }
  0x14   :  { %s27_s24 = sshll.u32 %s401_s23, 4  ;;  %p349_p8 = scmp.ne.s32.totalorder %s504_s1, %s348_s27  ;;  %s28_s24 = int_to_ptr.vmem [resolvable:$true] %s27_s24 }
  0x15   :  { %p352_p9 = scmp.lt.u32.totalorder %s348_s27, %s504_s1 }
  0x17   :  { %p354_p10 = pnand %p352_p9, %p349_p8 }
  0x19   :  { %357 = shalt.err (!%p354_p10)
}
  0x1a   :  { %s358_s4 = scalar_lea.vmem %s28_s24, 512  ;;  %p363_p12 = scmp.lt.s32.totalorder %s28_s24, %s28_s24 }
  0x1b   :  { %p359_p11 = scmp.ne.s32.totalorder %s28_s24, %s358_s4  ;;  %p364_p13 = scmp.lt.s32.totalorder %s358_s4, %s358_s4 }
  0x1d   :  { %p365_p0 = por %p364_p13, %p363_p12 }
  0x1f   :  { %p366_p1 = pnand %p365_p0, %p359_p11 }
  0x21   :  { %369 = shalt.err (!%p366_p1)
}
  0x22   :  { %33 = dma.hbm_to_vmem [thread:$0]  %s504_s1, 512, %s28_s24, [#allocation6], %s399_s19, %s399_s19, %s400_s20  }
  0x23   :  { %392 = dma.done.wait [#allocation3], 256  }
  0x24   :  { %393 = vsyncadd [#allocation3], 4294967040 }
  0x25   :  { %394 = dma.done.wait [#allocation6], 512  }
  0x26   :  { %395 = vsyncadd [#allocation6], 4294966784  ;;  %vm46_vm0 = vcmask 261120   ;;  %v42_v0 = vld [vmem:[#allocation5] sm:$0xff]  ;;  %v43_v1 = vld [vmem:[#allocation5 + $0x8] sm:$0xff]  ;;  %v128_v8 = vlaneseq  ;;  %s402_s1 = smov [#allocation7]  }
  0x27   :  { %v44_v2 = vld [vmem:[#allocation5 + $0x10] sm:$0xff]  ;;  %v297_v3 = vpack.c.bf16 %v43_v1, %v42_v0  ;;  %v45_v4 = vld [vmem:[#allocation5 + $0x18] sm:$0xff]  ;;  %s265_s6 = sshll.u32 %s402_s1, 4  ;;  %s266_s6 = int_to_ptr.vmem [resolvable:$true] %s265_s6 }
  0x28   :  { %v40_v5 = vld [vmem:[#allocation2] sm:$0xff]  ;;  %v301_v6 = vpack.c.bf16 %v45_v4, %v44_v2  ;;  %v41_v7 = vld [vmem:[#allocation2 + $0x8] sm:$0xff]  ;;  %v448_v9 = vand.u32 127, %v128_v8  ;;  %s370_s7 = scalar_lea.vmem %s266_s6, 256  ;;  %p375_p3 = scmp.lt.s32.totalorder %s266_s6, %s266_s6 }
  0x29   :  { %294 = vmatprep.mubr.msk.f32.mxu0 %vm46_vm0, %v40_v5  ;;  %298 = vmatprep.subr.bf16.mxu0 %v297_v3  ;;  %p371_p2 = scmp.ne.s32.totalorder %s266_s6, %s370_s7  ;;  %p376_p4 = scmp.lt.s32.totalorder %s370_s7, %s370_s7 }
  0x2a   :  { %300 = vmatpush3.bf16.msra.mxu0 %v297_v3  ;;  %vm130_vm1 = vcmp.lt.s32.totalorder %v448_v9, 8  ;;  %vm169_vm8 = vcmp.eq.s32.totalorder %v448_v9, 0  ;;  %vm217_vm9 = vcmp.eq.s32.totalorder %v448_v9, 1  ;;  %vm172_vm14 = vcmp.eq.s32.totalorder %v448_v9, 64 }
  0x2b   :  { %302 = vmatprep.subr.bf16.mxu0 %v301_v6  ;;  %vm220_vm15 = vcmp.eq.s32.totalorder %v448_v9, 65  ;;  %p377_p5 = por %p376_p4, %p375_p3 }
  0x2d   :  { %p378_p6 = pnand %p377_p5, %p371_p2 }
  0x2e   :  { %304 = vmatpush3.bf16.msra.mxu0 %v301_v6 }
  0x31   :  { %295 = vmatmul.mubr.msk.f32.vlgmr.msra.gmra.mrb[0].mxu0 %vm46_vm0, %v41_v7  ;;  %vm255_vm0 = vcmp.lt.s32.totalorder %v448_v9, 64 }
 0x104   :  { %v296_v10 = vpop.f32.mrb[0].mxu0 }
 0x105   :  { %v119_v11 = vpop.f32.mrb[1].mxu0  ;;  %v132_v13 = vsel %vm130_vm1, %v296_v10, -1e+30 }
 0x106   :  { %v131_v12 = vsel %vm130_vm1, %v119_v11, -1e+30 }
 0x107   :  { %133 = vmax.xlane.f32.xlu0 %v131_v12 }
 0x10b   :  { %135 = vmax.xlane.f32.xlu0 %v132_v13 }
 0x194   :  { %v134_v14 = vpop.xlane.xlu0 %133 }
 0x195   :  { %vm137_vm2 = vcmp.eq.f32.partialorder %v131_v12, %v134_v14  ;;  %v225_v30 = vsub.f32 %v131_v12, %v134_v14  ;;  %v170_v48 = vsel %vm169_vm8, %v134_v14, -1e+30 }
 0x196   :  { %v139_v15 = vsel %vm137_vm2, %v448_v9, 128 }
 0x197   :  { %v142_v16 = vshra.s32 %v139_v15, 16  ;;  %v141_v22 = vand.u32 65535, %v139_v15  ;;  %v227_v31 = vmul.f32 1.442695, %v225_v30 }
 0x198   :  { %v452_v17 = vpop.xlane.xlu0 %135 }
 0x199   :  { %v144_v18 = vcvt.s32.f32 %v142_v16  ;;  %vm138_vm3 = vcmp.eq.f32.partialorder %v132_v13, %v452_v17  ;;  %v143_v24 = vcvt.s32.f32 %v141_v22  ;;  %v226_v32 = vsub.f32 %v132_v13, %v452_v17 }
 0x19a   :  { %v140_v19 = vsel %vm138_vm3, %v448_v9, 128  ;;  %310 = vpow2.f32 %v227_v31  ;;  %v171_v55 = vsel %vm169_vm8, %v452_v17, -1e+30 }
 0x19b   :  { %145 = vmin.xlane.f32.xlu1 %v144_v18  ;;  %v156_v20 = vshra.s32 %v140_v19, 16  ;;  %v155_v25 = vand.u32 65535, %v140_v19  ;;  %v229_v34 = vmul.f32 1.442695, %v226_v32 }
 0x19d   :  { %v158_v21 = vcvt.s32.f32 %v156_v20  ;;  %v157_v28 = vcvt.s32.f32 %v155_v25  ;;  %312 = vpow2.f32 %v229_v34 }
 0x19f   :  { %159 = vmin.xlane.f32.xlu1 %v158_v21 }
 0x1a4   :  { %v311_v45 = vpop.eup %310 }
 0x1a7   :  { %v313_v47 = vpop.eup %312 }
 0x228   :  { %v146_v23 = vpop.xlane.xlu1 %145 }
 0x229   :  { %vm147_vm4 = vcmp.eq.f32.partialorder %v144_v18, %v146_v23  ;;  %v152_v33 = vcvt.f32.s32 %v146_v23 }
 0x22a   :  { %v148_v26 = vsel %vm147_vm4, %v143_v24, inf }
 0x22b   :  { %149 = vmin.xlane.f32.xlu0 %v148_v26  ;;  %v153_v36 = vshll.u32 %v152_v33, 16 }
 0x22c   :  { %v160_v27 = vpop.xlane.xlu1 %159 }
 0x22d   :  { %vm161_vm5 = vcmp.eq.f32.partialorder %v158_v21, %v160_v27  ;;  %v166_v37 = vcvt.f32.s32 %v160_v27 }
 0x22e   :  { %v162_v29 = vsel %vm161_vm5, %v157_v28, inf }
 0x22f   :  { %163 = vmin.xlane.f32.xlu1 %v162_v29  ;;  %v167_v41 = vshll.u32 %v166_v37, 16 }
 0x2b8   :  { %v150_v35 = vpop.xlane.xlu0 %149 }
 0x2b9   :  { %v151_v38 = vcvt.f32.s32 %v150_v35 }
 0x2bb   :  { %v457_v39 = vadd.s32 %v153_v36, %v151_v38 }
 0x2bc   :  { %v164_v40 = vpop.xlane.xlu1 %163 }
 0x2bd   :  { %v165_v42 = vcvt.f32.s32 %v164_v40  ;;  %vm177_vm6 = vcmp.eq.s32.totalorder %v448_v9, %v457_v39  ;;  %v173_v26 = vcvt.s32.f32 %v457_v39 }
 0x2be   :  { %v179_v43 = vsel %vm177_vm6, -3e+38, %v131_v12 }
 0x2bf   :  { %v461_v44 = vadd.s32 %v167_v41, %v165_v42  ;;  %181 = vmax.xlane.f32.xlu0 %v179_v43  ;;  %v175_v33 = vsel %vm172_vm14, %v173_v26, 0.0 }
 0x2c1   :  { %vm178_vm7 = vcmp.eq.s32.totalorder %v448_v9, %v461_v44  ;;  %v174_v34 = vcvt.s32.f32 %v461_v44 }
 0x2c2   :  { %v180_v46 = vsel %vm178_vm7, -3e+38, %v132_v13 }
 0x2c3   :  { %183 = vmax.xlane.f32.xlu1 %v180_v46  ;;  %231 = vadd.xlane.f32.xlu0 %v311_v45  ;;  %v176_v41 = vsel %vm172_vm14, %v174_v34, 0.0 }
 0x2c7   :  { %233 = vadd.xlane.f32.xlu1 %v313_v47 }
 0x34c   :  { %v182_v49 = vpop.xlane.xlu0 %181 }
 0x34d   :  { %vm185_vm10 = vcmp.eq.f32.partialorder %v179_v43, %v182_v49  ;;  %v218_v50 = vsel %vm217_vm9, %v182_v49, %v170_v48 }
 0x34e   :  { %v187_v51 = vsel %vm185_vm10, %v448_v9, 128  ;;  %v235_v52 = vsub.f32 %v218_v50, %v134_v14 }
 0x34f   :  { %v190_v53 = vshra.s32 %v187_v51, 16  ;;  %v189_v8 = vand.u32 65535, %v187_v51 }
 0x350   :  { %v237_v54 = vmul.f32 1.442695, %v235_v52  ;;  %v184_v56 = vpop.xlane.xlu1 %183  ;;  %v232_v57 = vpop.xlane.xlu0 %231 }
 0x351   :  { %vm186_vm11 = vcmp.eq.f32.partialorder %v180_v46, %v184_v56  ;;  %v219_v58 = vsel %vm217_vm9, %v184_v56, %v171_v55  ;;  %314 = vrcp.f32 %v232_v57  ;;  %v192_v59 = vcvt.s32.f32 %v190_v53 }
 0x352   :  { %316 = vpow2.f32 %v237_v54  ;;  %v188_v60 = vsel %vm186_vm11, %v448_v9, 128  ;;  %v236_v61 = vsub.f32 %v219_v58, %v452_v17  ;;  %v191_v11 = vcvt.s32.f32 %v189_v8 }
 0x353   :  { %193 = vmin.xlane.f32.xlu0 %v192_v59  ;;  %v204_v62 = vshra.s32 %v188_v60, 16  ;;  %v203_v12 = vand.u32 65535, %v188_v60 }
 0x354   :  { %v239_v63 = vmul.f32 1.442695, %v236_v61  ;;  %v234_v0 = vpop.xlane.xlu1 %233 }
 0x355   :  { %318 = vrcp.f32 %v234_v0  ;;  %v206_v1 = vcvt.s32.f32 %v204_v62  ;;  %v205_v15 = vcvt.s32.f32 %v203_v12 }
 0x356   :  { %320 = vpow2.f32 %v239_v63 }
 0x357   :  { %207 = vmin.xlane.f32.xlu1 %v206_v1 }
 0x35b   :  { %v315_v2 = vpop.eup %314 }
 0x35c   :  { %v317_v3 = vpop.eup %316 }
 0x35d   :  { %v243_v4 = vmul.f32 %v317_v3, %v315_v2 }
 0x35f   :  { %v319_v5 = vpop.eup %318  ;;  %245 = vadd.xlane.f32.xlu0 %v243_v4 }
 0x360   :  { %v321_v6 = vpop.eup %320 }
 0x361   :  { %v244_v7 = vmul.f32 %v321_v6, %v319_v5 }
 0x363   :  { %247 = vadd.xlane.f32.xlu1 %v244_v7 }
 0x3e0   :  { %v194_v10 = vpop.xlane.xlu0 %193 }
 0x3e1   :  { %vm195_vm12 = vcmp.eq.f32.partialorder %v192_v59, %v194_v10  ;;  %v200_v21 = vcvt.f32.s32 %v194_v10 }
 0x3e2   :  { %v196_v13 = vsel %vm195_vm12, %v191_v11, inf }
 0x3e3   :  { %197 = vmin.xlane.f32.xlu0 %v196_v13  ;;  %v201_v23 = vshll.u32 %v200_v21, 16 }
 0x3e4   :  { %v208_v14 = vpop.xlane.xlu1 %207 }
 0x3e5   :  { %vm209_vm13 = vcmp.eq.f32.partialorder %v206_v1, %v208_v14  ;;  %v214_v24 = vcvt.f32.s32 %v208_v14 }
 0x3e6   :  { %v210_v16 = vsel %vm209_vm13, %v205_v15, inf }
 0x3e7   :  { %211 = vmin.xlane.f32.xlu1 %v210_v16  ;;  %v215_v30 = vshll.u32 %v214_v24, 16 }
 0x3ec   :  { %v246_v17 = vpop.xlane.xlu0 %245 }
 0x3ed   :  { %v249_v18 = vadd.f32 1e-20, %v246_v17 }
 0x3ef   :  { %322 = vrcp.f32 %v249_v18 }
 0x3f0   :  { %v248_v19 = vpop.xlane.xlu1 %247 }
 0x3f1   :  { %v250_v20 = vadd.f32 1e-20, %v248_v19 }
 0x3f3   :  { %324 = vrcp.f32 %v250_v20 }
 0x3f9   :  { %v323_v27 = vpop.eup %322 }
 0x3fa   :  { %v253_v35 = vmul.f32 %v323_v27, %v243_v4 }
 0x3fd   :  { %v325_v36 = vpop.eup %324 }
 0x3fe   :  { %v254_v42 = vmul.f32 %v325_v36, %v244_v7 }
 0x470   :  { %v198_v22 = vpop.xlane.xlu0 %197 }
 0x471   :  { %v199_v25 = vcvt.f32.s32 %v198_v22 }
 0x473   :  { %v202_v28 = vadd.s32 %v201_v23, %v199_v25 }
 0x474   :  { %v212_v29 = vpop.xlane.xlu1 %211 }
 0x475   :  { %v221_v31 = vcvt.s32.f32 %v202_v28  ;;  %v213_v32 = vcvt.f32.s32 %v212_v29 }
 0x477   :  { %v216_v37 = vadd.s32 %v215_v30, %v213_v32  ;;  %v223_v38 = vsel %vm220_vm15, %v221_v31, %v175_v33 }
 0x478   :  { %v256_v39 = vsel %vm255_vm0, %v253_v35, %v223_v38 }
 0x479   :  { %v222_v40 = vcvt.s32.f32 %v216_v37  ;;  %258 = vst [vmem:[#allocation7] sm:$0xff] %v256_v39 }
 0x47b   :  { %v224_v43 = vsel %vm220_vm15, %v222_v40, %v176_v41 }
 0x47c   :  { %v257_v44 = vsel %vm255_vm0, %v254_v42, %v224_v43 }
 0x47d   :  { %259 = vst [vmem:[#allocation7 + $0x8] sm:$0xff] %v257_v44 }
 0x47e   :  { %381 = shalt.err (!%p378_p6)
}
 0x47f   :  { %s382_s10 = scalar_lea.hbm %s505_s2, 256 }
 0x480   :  { %p383_p7 = scmp.ne.s32.totalorder %s505_s2, %s382_s10  ;;  %p386_p8 = scmp.lt.u32.totalorder %s382_s10, %s505_s2 }
 0x482   :  { %p388_p9 = pnand %p386_p8, %p383_p7 }
 0x484   :  { %391 = shalt.err (!%p388_p9)
}
 0x485   :  { %271 = dma.vmem_to_hbm [thread:$0]  %s266_s6, 256, %s505_s2, [#allocation4], %s399_s19, %s399_s19, %s400_s20  }
 0x486   :  { %396 = dma.done.wait [#allocation4], 256  }
 0x487   :  { %397 = vsyncadd [#allocation4], 4294967040 }
 0x488   :  { %275 = vsyncpa [#allocation3], 1 }
 0x489   :  { %276 = vsyncpa [#allocation6], 1 }
 0x48a   :  { %277 = vsyncpa [#allocation4], 1 }

</bundles_post_ra>
